<compile_context>
chip_gen: v5e
topology: v5e:2x2
jax: 0.10.0
libtpu: 0.0.40
codegen_flags: <defaults>
</compile_context>

<pallas_src>
import functools

import jax
import jax.numpy as jnp
from jax.experimental import pallas as pl
from jax.experimental.pallas import tpu as pltpu

_LANE = 128      # lane width (last dim vreg tiling)
_SUBLANE = 8     # f32 sublane tiling (second-to-last dim)


def _round_up(x: int, mult: int) -> int:
    return -(-x // mult) * mult


def _cls_head_kernel(x_ref, w_ref, o_ref):
    # x_ref: [tm, K] activation tile (pipelined over the M grid axis)
    # w_ref: [K, N_pad] weight, VMEM-resident across all grid steps
    # o_ref: [tm, N_pad] lane-dense output tile
    o_ref[...] = jnp.dot(
        x_ref[...], w_ref[...], preferred_element_type=jnp.float32
    ).astype(o_ref.dtype)


def prepare_classification_head_weight(weight: jax.Array,
                                        activation_dtype) -> jax.Array:
    """One-time weight prep (hoist off the per-call inference path).

    weight: [num_labels, input_dim]  (PyTorch nn.Linear layout, bias=False)
    returns: [input_dim, N_pad] in the activation dtype, N_pad = lane-padded
             num_labels (multiple of 128, zero padded).
    """
    num_labels, input_dim = weight.shape
    n_pad = _round_up(max(num_labels, 1), _LANE)
    w_t = weight.astype(activation_dtype).T          # [K, N]
    if n_pad != num_labels:
        w_t = jnp.pad(w_t, ((0, 0), (0, n_pad - num_labels)))
    return w_t


def classification_head_forward(hidden_state: jax.Array,
                                w_prepared: jax.Array,
                                num_labels: int,
                                *,
                                block_m: int = 512) -> jax.Array:
    """
    hidden_state: [..., input_dim]
    w_prepared:   output of prepare_classification_head_weight
    returns:      logits [..., num_labels]
    """
    orig_shape = hidden_state.shape
    input_dim = orig_shape[-1]
    k, n_pad = w_prepared.shape
    assert k == input_dim, (k, input_dim)

    # Flatten leading dims to a single M axis.
    x2d = hidden_state.reshape(-1, input_dim)
    m = x2d.shape[0]

    # M tile: big (default 512 rows) for DMA/compute overlap at the HBM
    # roofline, but never larger than the (sublane-aligned) problem.
    tm = min(block_m, _round_up(m, _SUBLANE))
    m_pad = _round_up(m, tm)
    if m_pad != m:
        x2d = jnp.pad(x2d, ((0, m_pad - m), (0, 0)))
    grid_m = m_pad // tm

    # VMEM sizing: double-buffered x and out tiles + resident weight.
    itemsize = jnp.dtype(hidden_state.dtype).itemsize
    need = (2 * (tm * k + tm * n_pad) + k * n_pad) * itemsize
    # Leave headroom; clamp so it also fits v7x's 64 MiB physical VMEM.
    vmem_limit = int(min(max(2 * need, 32 * 1024 * 1024), 56 * 1024 * 1024))

    out = pl.pallas_call(
        _cls_head_kernel,
        out_shape=jax.ShapeDtypeStruct((m_pad, n_pad), hidden_state.dtype),
        grid_spec=pltpu.PrefetchScalarGridSpec(
            num_scalar_prefetch=0,
            grid=(grid_m,),
            in_specs=[
                pl.BlockSpec((tm, k), lambda i: (i, 0)),       # x tiles, pipelined
                pl.BlockSpec((k, n_pad), lambda i: (0, 0)),    # weight, resident
            ],
            out_specs=pl.BlockSpec((tm, n_pad), lambda i: (i, 0)),
        ),
        compiler_params=pltpu.CompilerParams(
            dimension_semantics=("parallel",),   # no reduction axis in the grid
            vmem_limit_bytes=vmem_limit,
        ),
    )(x2d, w_prepared)

    # Drop M padding and lane padding, restore leading dims.
    out = out[:m, :num_labels]
    return out.reshape(*orig_shape[:-1], num_labels)


if __name__ == "__main__":
    # Small shapes consistent with the module's forward.
    batch, seq, input_dim, num_labels = 2, 8, 32, 4

    key = jax.random.PRNGKey(0)
    k_x, k_w = jax.random.split(key)

    hidden_state = jax.random.normal(k_x, (batch, seq, input_dim), dtype=jnp.float32)
    # out_proj.weight: [num_labels, input_dim], bias=False.
    out_proj_weight = (
        jax.random.normal(k_w, (num_labels, input_dim), dtype=jnp.float32) * 0.02
    )

    # One-time weight prep (would live at module init in a real deployment).
    w_prepared = prepare_classification_head_weight(out_proj_weight, hidden_state.dtype)

    fwd = jax.jit(
        functools.partial(classification_head_forward, num_labels=num_labels)
    )
    logits = fwd(hidden_state, w_prepared)
    logits = jax.block_until_ready(logits)

    # Reference: dropout is identity, no bias.
    ref = hidden_state @ out_proj_weight.T
    assert logits.shape == (batch, seq, num_labels), logits.shape
    assert jnp.allclose(logits, ref, atol=1e-5, rtol=1e-5)

    print("KERNEL_OK")
</pallas_src>

<mosaic_0001>
module attributes {stable_mosaic.version = 11 : i64} {
  func.func @_cls_head_kernel(%arg0: i32, %arg1: memref<16x32xf32, #tpu.memory_space<vmem>>, %arg2: memref<32x128xf32, #tpu.memory_space<vmem>>, %arg3: memref<16x128xf32, #tpu.memory_space<vmem>>) attributes {dimension_semantics = [#tpu.dimension_semantics<parallel>], iteration_bounds = array<i64: 1>, scalar_prefetch = 0 : i64, scratch_operands = 0 : i64, tpu.core_type = #tpu.core_type<tc>, window_params = [{transform_indices = @transform_0, window_bounds = array<i64: 16, 32>}, {pipeline_mode = #tpu.pipeline_mode<synchronous>, transform_indices = @transform_1, window_bounds = array<i64: 32, 128>}, {transform_indices = @transform_2, window_bounds = array<i64: 16, 128>}]} {
    %c0 = arith.constant 0 : index
    %c0_0 = arith.constant 0 : index
    %0 = vector.load %arg1[%c0, %c0_0] : memref<16x32xf32, #tpu.memory_space<vmem>>, vector<16x32xf32>
    %c0_1 = arith.constant 0 : index
    %c0_2 = arith.constant 0 : index
    %1 = vector.load %arg2[%c0_1, %c0_2] : memref<32x128xf32, #tpu.memory_space<vmem>>, vector<32x128xf32>
    %cst = arith.constant dense<0.000000e+00> : vector<16x128xf32>
    %2 = tpu.matmul %0, %1, %cst {dimension_numbers = #tpu.dot_dimension_numbers<[1], [0], [0], [1], [0, 0, 1, 1], [], []>} : vector<16x32xf32>, vector<32x128xf32>, vector<16x128xf32> -> vector<16x128xf32>
    %c0_3 = arith.constant 0 : index
    %c0_4 = arith.constant 0 : index
    %3 = vector.load %arg3[%c0_3, %c0_4] : memref<16x128xf32, #tpu.memory_space<vmem>>, vector<16x128xf32>
    tpu.vector_store %arg3[%c0_3, %c0_4], %2 {strides = array<i32>} : memref<16x128xf32, #tpu.memory_space<vmem>>, vector<16x128xf32>,
    return
  }
  func.func @transform_0(%arg0: i32) -> (i32, i32) {
    %c0_i32 = arith.constant 0 : i32
    %c0_i32_0 = arith.constant 0 : i32
    return %arg0, %c0_i32 : i32, i32
  }
  func.func @transform_1(%arg0: i32) -> (i32, i32) {
    %c0_i32 = arith.constant 0 : i32
    %c0_i32_0 = arith.constant 0 : i32
    %c0_i32_1 = arith.constant 0 : i32
    return %c0_i32, %c0_i32_0 : i32, i32
  }
  func.func @transform_2(%arg0: i32) -> (i32, i32) {
    %c0_i32 = arith.constant 0 : i32
    %c0_i32_0 = arith.constant 0 : i32
    return %arg0, %c0_i32 : i32, i32
  }
}

</mosaic_0001>

<bundles_post_ra>
// kernel: classification_head_forward.1
= control target key start
LH: loop header
LB: loop body
LE: loop exit
PB: predicated region body
PF: predicated region fallthrough
CT: control target
= control target key end

     0   :  { %7 = vsyncpa [#allocation3], 0  ;;  %s180_s0 = inlined_call_operand.hbm [shape: f32[16,32], index: 0, kind: input, shape index: {}]   ;;  %s181_s1 = inlined_call_operand.hbm [shape: f32[32,128], index: 1, kind: input, shape index: {}]   ;;  %s182_s2 = inlined_call_operand.vmem [shape: f32[16,128], index: 2, kind: output, shape index: {}]  }
   0x1   :  { %s13_s11 = sshll.u32 %s180_s0, 4  ;;  %s14_s11 = int_to_ptr.hbm [resolvable:$true] %s13_s11 }
   0x2   :  { %8 = vsyncpa [#allocation5], 0  ;;  %s149_s12 = smov [#allocation2]   ;;  %s26_s16 = sshll.u32 %s181_s1, 4  ;;  %s27_s16 = int_to_ptr.hbm [resolvable:$true] %s26_s16 }
   0x3   :  { %s15_s13 = sshll.u32 %s149_s12, 4  ;;  %s150_s17 = smov 128   ;;  %s16_s13 = int_to_ptr.vmem [resolvable:$true] %s15_s13 }
   0x4   :  { %s151_s18 = smov 8   ;;  %s152_s19 = smov [#allocation4]  }
   0x5   :  { %21 = dma.hbm_to_vmem [thread:$0]  %s14_s11, 256, %s16_s13, [#allocation3], %s150_s17, %s150_s17, %s151_s18  }
   0x6   :  { %s28_s20 = sshll.u32 %s152_s19, 4  ;;  %s29_s20 = int_to_ptr.vmem [resolvable:$true] %s28_s20 }
   0x7   :  { %34 = dma.hbm_to_vmem [thread:$0]  %s27_s16, 512, %s29_s20, [#allocation5], %s150_s17, %s150_s17, %s151_s18  }
   0x8   :  { %145 = dma.done.wait [#allocation3], 256  }
   0x9   :  { %146 = vsyncadd [#allocation3], 4294967040 }
   0xa   :  { %147 = dma.done.wait [#allocation5], 512  }
   0xb   :  { %148 = vsyncadd [#allocation5], 4294966784  ;;  %v48_v0 = vld [vmem:[#allocation4 + $0x18] sm:$0xff]  ;;  %v47_v1 = vld [vmem:[#allocation4 + $0x10] sm:$0xff]  ;;  %vm49_vm0 = vcmask 261120  }
   0xc   :  { %68 = vmatpush.msra.mxu0 %v48_v0  ;;  %89 = vmatpush.msra.mxu1 %v48_v0  ;;  %v46_v2 = vld [vmem:[#allocation4 + $0x8] sm:$0xff]  ;;  %v45_v3 = vld [vmem:[#allocation4] sm:$0xff]  ;;  %v43_v4 = vld [vmem:[#allocation2] sm:$0xff] }
   0xd   :  { %v44_v5 = vld [vmem:[#allocation2 + $0x8] sm:$0xff] }
   0xe   :  { %69 = vmatpush.msra.mxu0 %v47_v1  ;;  %90 = vmatpush.msra.mxu1 %v47_v1 }
  0x10   :  { %70 = vmatpush.msra.mxu0 %v46_v2  ;;  %91 = vmatpush.msra.mxu1 %v46_v2 }
  0x12   :  { %71 = vmatpush.msra.mxu0 %v45_v3  ;;  %92 = vmatpush.msra.mxu1 %v45_v3 }
  0x13   :  { %87 = vmatmul.msk.f32.vlgmr.msra.gmra.mxu0 %vm49_vm0, %v43_v4  ;;  %88 = vmatmul.msk.f32.vlgmr.msra.gmra.mxu1 %vm49_vm0, %v44_v5 }
  0x90   :  { %v73_v6 = vpop.f32.mrf.mxu0  ;;  %v76_v7 = vpop.f32.mrf.mxu1 }
  0x91   :  { %79 = vst [vmem:[%s182_s2] sm:$0xff] %v73_v6 }
  0x92   :  { %80 = vst [vmem:[%s182_s2 + $0x8] sm:$0xff] %v76_v7 }
  0x93   :  { %85 = vsyncpa [#allocation3], 1 }
  0x94   :  { %86 = vsyncpa [#allocation5], 1 }

</bundles_post_ra>
